<compile_context>
chip_gen: v5e
topology: v5e:2x2
jax: 0.10.0
libtpu: 0.0.40
codegen_flags: <defaults>
</compile_context>

<pallas_src>
import jax
import jax.numpy as jnp
from jax.experimental import pallas as pl
from jax.experimental.pallas import tpu as pltpu


_PARALLEL = pltpu.CompilerParams(dimension_semantics=("parallel",))
_TARGET_BLOCK_BYTES = 2 << 20  # ~2 MiB per input block (before double-buffering)
_IMPL_CACHE = {}


# ---------------------------------------------------------------------------
# kernels
# ---------------------------------------------------------------------------

def _pool_kernel_strided(x_ref, o_ref):
    """Fused: x_ref (TM, 2*L_out) -> o_ref (TM, L_out) via strided even/odd views."""
    l_out = o_ref.shape[-1]
    even = x_ref[:, pl.ds(0, l_out, stride=2)]
    odd = x_ref[:, pl.ds(1, l_out, stride=2)]
    o_ref[...] = jnp.maximum(even, odd)


def _pool_kernel_reshape(x_ref, o_ref):
    """Fused: x_ref (TM, 2*L_out) -> o_ref (TM, L_out) via reshape + pair-max."""
    tm, l_in = x_ref.shape
    x = x_ref[...]
    o_ref[...] = jnp.max(x.reshape(tm, l_in // 2, 2), axis=-1)


def _maximum_kernel(x_ref, o_ref):
    """Fallback: x_ref (2, TR, W) pre-de-interleaved streams -> o_ref (TR, W)."""
    o_ref[...] = jnp.maximum(x_ref[0], x_ref[1])


# ---------------------------------------------------------------------------
# wrappers
# ---------------------------------------------------------------------------

def _pick_row_tile(num_rows, row_bytes, target_bytes=_TARGET_BLOCK_BYTES):
    """Row-tile that is a multiple of 8 (or the full extent) and ~target_bytes."""
    rows = max(1, target_bytes // max(1, row_bytes))
    if num_rows <= rows or num_rows <= 8:
        return num_rows
    return max(8, (rows // 8) * 8)


def _pool_fused_call(x2, l_out, kernel):
    """Single-pass pooling: kernel de-interleaves pairs internally."""
    m, l_in = x2.shape
    tm = _pick_row_tile(m, l_in * x2.dtype.itemsize)
    return pl.pallas_call(
        kernel,
        out_shape=jax.ShapeDtypeStruct((m, l_out), x2.dtype),
        grid=(pl.cdiv(m, tm),),
        in_specs=[pl.BlockSpec((tm, l_in), lambda i: (i, 0))],
        out_specs=pl.BlockSpec((tm, l_out), lambda i: (i, 0)),
        compiler_params=_PARALLEL,
    )(x2)


def _pool_fused_strided(x2, l_out):
    return _pool_fused_call(x2, l_out, _pool_kernel_strided)


def _pool_fused_reshape(x2, l_out):
    return _pool_fused_call(x2, l_out, _pool_kernel_reshape)


def _pool_presplit_call(x2, l_out):
    """Guaranteed-lowering fallback: XLA even/odd split + lane-dense tiled max."""
    m, l_in = x2.shape
    dtype = x2.dtype
    total = m * l_out
    # De-interleave in XLA (one extra HBM pass), then flatten both streams
    # identically into lane-dense (R, W) slabs so kernel stores are unmasked.
    streams = x2.reshape(m, l_out, 2).transpose(2, 0, 1).reshape(2, total)
    w = 512
    pad = (-total) % w
    if pad:
        streams = jnp.pad(streams, ((0, 0), (0, pad)))
    r = (total + pad) // w
    tr = _pick_row_tile(r, 2 * w * dtype.itemsize)
    out = pl.pallas_call(
        _maximum_kernel,
        out_shape=jax.ShapeDtypeStruct((r, w), dtype),
        grid=(pl.cdiv(r, tr),),
        in_specs=[pl.BlockSpec((2, tr, w), lambda i: (0, i, 0))],
        out_specs=pl.BlockSpec((tr, w), lambda i: (i, 0)),
        compiler_params=_PARALLEL,
    )(streams.reshape(2, r, w))
    out = out.reshape(-1)
    if pad:
        out = out[:total]
    return out.reshape(m, l_out)


def _max_pool_pairs_2d(x2, l_out):
    """Pool adjacent pairs along the last axis of a (M, 2*L_out) array."""
    key = (x2.shape, str(x2.dtype))
    impl = _IMPL_CACHE.get(key)
    if impl is not None:
        return impl(x2, l_out)

    m = x2.shape[0]
    ref = jnp.max(x2.reshape(m, l_out, 2), axis=-1)  # one-time validation reference
    use_nan = bool(jnp.issubdtype(x2.dtype, jnp.floating))
    for candidate in (_pool_fused_strided, _pool_fused_reshape):
        try:
            out = candidate(x2, l_out)
            jax.block_until_ready(out)
            if bool(jnp.array_equal(out, ref, equal_nan=use_nan)):
                _IMPL_CACHE[key] = candidate
                return out
        except Exception:
            # Fused de-interleave not supported by this Mosaic version; try next.
            pass
    _IMPL_CACHE[key] = _pool_presplit_call
    return _pool_presplit_call(x2, l_out)


def max_pool1d_k2s2(x):
    """max_pool1d(x, kernel_size=2, stride=2) for x of shape (N, C, L)."""
    n, c, l = x.shape
    l_out = l // 2
    if n * c == 0 or l_out == 0:
        return jnp.zeros((n, c, l_out), dtype=x.dtype)
    x2 = x[:, :, : 2 * l_out].reshape(n * c, 2 * l_out)  # contiguous, no transpose
    out = _max_pool_pairs_2d(x2, l_out)
    return out.reshape(n, c, l_out)


def my_module_forward(x):
    """Mirror of MyModule.forward (branch on the static channel dimension)."""
    if x.shape[1] == 0 or x.shape[1] == 3 or x.shape[1] == 5:
        return x
    if x.ndim == 2:
        return max_pool1d_k2s2(x[None])[0]
    if x.ndim != 3:
        raise ValueError("max_pool1d expects a 2D or 3D input")
    return max_pool1d_k2s2(x)


if __name__ == "__main__":
    key = jax.random.PRNGKey(0)
    k1, k2, k3 = jax.random.split(key, 3)

    # Case 1: matches the reference script's input (1, 3, 10, 10) -> identity branch.
    x_id = jax.random.randint(k1, (1, 3, 10, 10), 0, 100, dtype=jnp.int32)
    y_id = my_module_forward(x_id)
    jax.block_until_ready(y_id)
    assert y_id.shape == x_id.shape
    assert bool(jnp.all(y_id == x_id))

    # Case 2: channels not in {0, 3, 5} -> max_pool1d(x, 2, 2) via the Pallas kernel.
    x_pool = jax.random.normal(k2, (2, 4, 16), dtype=jnp.float32)
    y_pool = my_module_forward(x_pool)
    jax.block_until_ready(y_pool)
    assert y_pool.shape == (2, 4, 8)
    ref = jnp.max(x_pool.reshape(2, 4, 8, 2), axis=-1)
    assert bool(jnp.allclose(y_pool, ref))

    # Case 3: larger, lane-dense shape exercising the tiled/pipelined path.
    x_big = jax.random.normal(k3, (4, 16, 1024), dtype=jnp.float32)
    y_big = my_module_forward(x_big)
    jax.block_until_ready(y_big)
    assert y_big.shape == (4, 16, 512)
    ref_big = jnp.max(x_big.reshape(4, 16, 512, 2), axis=-1)
    assert bool(jnp.allclose(y_big, ref_big))

    print("KERNEL_OK")
</pallas_src>

<mosaic_0001>
module attributes {stable_mosaic.version = 11 : i64} {
  func.func @_pool_kernel_strided(%arg0: i32, %arg1: memref<8x16xf32, #tpu.memory_space<vmem>>, %arg2: memref<8x8xf32, #tpu.memory_space<vmem>>) attributes {dimension_semantics = [#tpu.dimension_semantics<parallel>], iteration_bounds = array<i64: 1>, scalar_prefetch = 0 : i64, scratch_operands = 0 : i64, tpu.core_type = #tpu.core_type<tc>, window_params = [{transform_indices = @transform_0, window_bounds = array<i64: 8, 16>}, {transform_indices = @transform_1, window_bounds = array<i64: 8, 8>}]} {
    %c0 = arith.constant 0 : index
    %c0_0 = arith.constant 0 : index
    %0 = tpu.strided_load %arg1[%c0, %c0_0] {strides = array<i32: 1, 2>} : memref<8x16xf32, #tpu.memory_space<vmem>>, vector<8x8xf32>
    %c0_1 = arith.constant 0 : index
    %c1 = arith.constant 1 : index
    %1 = tpu.strided_load %arg1[%c0_1, %c1] {strides = array<i32: 1, 2>} : memref<8x16xf32, #tpu.memory_space<vmem>>, vector<8x8xf32>
    %2 = arith.maximumf %0, %1 : vector<8x8xf32>
    %c0_2 = arith.constant 0 : index
    %c0_3 = arith.constant 0 : index
    %3 = vector.load %arg2[%c0_2, %c0_3] : memref<8x8xf32, #tpu.memory_space<vmem>>, vector<8x8xf32>
    tpu.vector_store %arg2[%c0_2, %c0_3], %2 {strides = array<i32>} : memref<8x8xf32, #tpu.memory_space<vmem>>, vector<8x8xf32>,
    return
  }
  func.func @transform_0(%arg0: i32) -> (i32, i32) {
    %c0_i32 = arith.constant 0 : i32
    %c0_i32_0 = arith.constant 0 : i32
    return %arg0, %c0_i32 : i32, i32
  }
  func.func @transform_1(%arg0: i32) -> (i32, i32) {
    %c0_i32 = arith.constant 0 : i32
    %c0_i32_0 = arith.constant 0 : i32
    return %arg0, %c0_i32 : i32, i32
  }
}

module attributes {stable_mosaic.version = 11 : i64} {
  func.func @_pool_kernel_reshape(%arg0: i32, %arg1: memref<8x16xf32, #tpu.memory_space<vmem>>, %arg2: memref<8x8xf32, #tpu.memory_space<vmem>>) attributes {dimension_semantics = [#tpu.dimension_semantics<parallel>], iteration_bounds = array<i64: 1>, scalar_prefetch = 0 : i64, scratch_operands = 0 : i64, tpu.core_type = #tpu.core_type<tc>, window_params = [{transform_indices = @transform_0, window_bounds = array<i64: 8, 16>}, {transform_indices = @transform_1, window_bounds = array<i64: 8, 8>}]} {
    %c0 = arith.constant 0 : index
    %c0_0 = arith.constant 0 : index
    %0 = vector.load %arg1[%c0, %c0_0] : memref<8x16xf32, #tpu.memory_space<vmem>>, vector<8x16xf32>
    %1 = vector.shape_cast %0 : vector<8x16xf32> to vector<8x8x2xf32>
    %cst = arith.constant dense<0xFF800000> : vector<8x8xf32>
    %2 = vector.multi_reduction <maximumf>, %1, %cst [2] : vector<8x8x2xf32> to vector<8x8xf32>
    %c0_1 = arith.constant 0 : index
    %c0_2 = arith.constant 0 : index
    %3 = vector.load %arg2[%c0_1, %c0_2] : memref<8x8xf32, #tpu.memory_space<vmem>>, vector<8x8xf32>
    tpu.vector_store %arg2[%c0_1, %c0_2], %2 {strides = array<i32>} : memref<8x8xf32, #tpu.memory_space<vmem>>, vector<8x8xf32>,
    return
  }
  func.func @transform_0(%arg0: i32) -> (i32, i32) {
    %c0_i32 = arith.constant 0 : i32
    %c0_i32_0 = arith.constant 0 : i32
    return %arg0, %c0_i32 : i32, i32
  }
  func.func @transform_1(%arg0: i32) -> (i32, i32) {
    %c0_i32 = arith.constant 0 : i32
    %c0_i32_0 = arith.constant 0 : i32
    return %arg0, %c0_i32 : i32, i32
  }
}

module attributes {stable_mosaic.version = 11 : i64} {
  func.func @_maximum_kernel(%arg0: i32, %arg1: memref<2x1x512xf32, #tpu.memory_space<vmem>>, %arg2: memref<1x512xf32, #tpu.memory_space<vmem>>) attributes {dimension_semantics = [#tpu.dimension_semantics<parallel>], iteration_bounds = array<i64: 1>, scalar_prefetch = 0 : i64, scratch_operands = 0 : i64, tpu.core_type = #tpu.core_type<tc>, window_params = [{transform_indices = @transform_0, window_bounds = array<i64: 2, 1, 512>}, {transform_indices = @transform_1, window_bounds = array<i64: 1, 512>}]} {
    %c0 = arith.constant 0 : index
    %c0_0 = arith.constant 0 : index
    %c0_1 = arith.constant 0 : index
    %0 = vector.load %arg1[%c0, %c0_0, %c0_1] : memref<2x1x512xf32, #tpu.memory_space<vmem>>, vector<1x1x512xf32>
    %1 = vector.shape_cast %0 : vector<1x1x512xf32> to vector<1x512xf32>
    %c1 = arith.constant 1 : index
    %c0_2 = arith.constant 0 : index
    %c0_3 = arith.constant 0 : index
    %2 = vector.load %arg1[%c1, %c0_2, %c0_3] : memref<2x1x512xf32, #tpu.memory_space<vmem>>, vector<1x1x512xf32>
    %3 = vector.shape_cast %2 : vector<1x1x512xf32> to vector<1x512xf32>
    %4 = arith.maximumf %1, %3 : vector<1x512xf32>
    %c0_4 = arith.constant 0 : index
    %c0_5 = arith.constant 0 : index
    %5 = vector.load %arg2[%c0_4, %c0_5] : memref<1x512xf32, #tpu.memory_space<vmem>>, vector<1x512xf32>
    tpu.vector_store %arg2[%c0_4, %c0_5], %4 {strides = array<i32>} : memref<1x512xf32, #tpu.memory_space<vmem>>, vector<1x512xf32>,
    return
  }
  func.func @transform_0(%arg0: i32) -> (i32, i32, i32) {
    %c0_i32 = arith.constant 0 : i32
    %c0_i32_0 = arith.constant 0 : i32
    %c0_i32_1 = arith.constant 0 : i32
    return %c0_i32, %arg0, %c0_i32_0 : i32, i32, i32
  }
  func.func @transform_1(%arg0: i32) -> (i32, i32) {
    %c0_i32 = arith.constant 0 : i32
    %c0_i32_0 = arith.constant 0 : i32
    return %arg0, %c0_i32 : i32, i32
  }
}

</mosaic_0001>

<bundles_post_ra>
// kernel: tpu_custom_call.1
= control target key start
LH: loop header
LB: loop body
LE: loop exit
PB: predicated region body
PF: predicated region fallthrough
CT: control target
= control target key end

     0   :  { %6 = vsyncpa [#allocation3], 0  ;;  %s358_s0 = inlined_call_operand.hbm [shape: f32[8,16], index: 0, kind: input, shape index: {}]   ;;  %s359_s1 = inlined_call_operand.hbm [shape: f32[8,8], index: 1, kind: output, shape index: {}]  }
   0x1   :  { %7 = vsyncpa [#allocation4], 0  ;;  %s13_s8 = sshll.u32 %s358_s0, 4  ;;  %s299_s9 = smov [#allocation2]   ;;  %s14_s8 = int_to_ptr.hbm [resolvable:$true] %s13_s8 }
   0x2   :  { %s15_s10 = sshll.u32 %s299_s9, 4  ;;  %s16_s10 = int_to_ptr.vmem [resolvable:$true] %s15_s10 }
   0x3   :  { %18 = dma.hbm_to_vmem [thread:$0]  %s14_s8, 128, %s16_s10, [#allocation3]  }
   0x4   :  { %295 = dma.done.wait [#allocation3], 128  }
   0x5   :  { %296 = vsyncadd [#allocation3], 4294967168  ;;  %v23_v0 = vld [vmem:[#allocation2] sm:$0xff]  ;;  %s300_s11 = smov 116   ;;  %s301_s12 = smov 122   ;;  %vm47_vm0 = vcmask 1047556  }
   0x6   :  { %40 = vrot.lane.b32.xlu1 %v23_v0, %s300_s11  ;;  %31 = vrot.lane.b32.xlu0 %v23_v0, %s301_s12  ;;  %s302_s13 = smov 124   ;;  %s303_s14 = smov 126   ;;  %v307_v4 = vmov 1983009808   ;;  %v308_v20 = vmov 1934713408  }
   0x7   :  { %28 = vrot.lane.b32.xlu2 %v23_v0, %s302_s13  ;;  %s304_s15 = smov 114   ;;  %s305_s16 = smov 118   ;;  %v52_v5 = vunpack.c.l.s4 %v307_v4  ;;  %v100_v21 = vunpack.c.l.s4 %v308_v20  ;;  %v49_v22 = vrot.slane %v23_v0, 4  ;;  %vm159_vm1 = vcmask 15360  }
   0x8   :  { %s306_s0 = smov 120   ;;  %vm202_vm2 = vcmask 1041409   ;;  %vm204_vm3 = vcmask 1042434   ;;  %vm206_vm4 = vcmask 1043459   ;;  %vm208_vm5 = vcmask 1044484   ;;  %s309_s17 = smov [#allocation5]  }
   0x9   :  { %v53_v8 = vunpack.c.0.s8 %v52_v5  ;;  %v101_v30 = vunpack.c.0.s8 %v100_v21  ;;  %vm210_vm6 = vcmask 1045509   ;;  %vm212_vm7 = vcmask 1046534   ;;  %s224_s18 = sshll.u32 %s309_s17, 4  ;;  %s226_s21 = sshll.u32 %s359_s1, 4  ;;  %s225_s18 = int_to_ptr.vmem [resolvable:$true] %s224_s18  ;;  %s227_s21 = int_to_ptr.hbm [resolvable:$true] %s226_s21 }
   0xa   :  { %vm214_vm8 = vcmask 1047559   ;;  %vm217_vm9 = vcmask 64512  }
   0xe   :  { %25 = vrot.lane.b32.xlu1 %v23_v0, %s303_s14  ;;  %43 = vrot.lane.b32.xlu0 %v23_v0, %s304_s15 }
   0xf   :  { %37 = vrot.lane.b32.xlu2 %v23_v0, %s305_s16 }
  0x16   :  { %34 = vrot.lane.b32.xlu0 %v23_v0, %s306_s0 }
  0x61   :  { %v29_v1 = vpop.permute.xlu2 %28 }
  0x62   :  { %v46_v6 = vrot.slane %v29_v1, 4  ;;  %v50_v31 = vsel %vm47_vm0, %v29_v1, %v49_v22 }
  0x63   :  { %v58_v40 = vperm.slane %v50_v31, %v53_v8 }
  0x64   :  { %v48_v10 = vsel %vm47_vm0, %v46_v6, %v23_v0 }
  0x65   :  { %v54_v18 = vperm.slane %v48_v10, %v53_v8  ;;  %v109_v62 = vrot.slane %v58_v40, 4 }
  0x67   :  { %v97_v28 = vrot.slane %v54_v18, 4 }
  0x69   :  { %v38_v7 = vpop.permute.xlu2 %37 }
  0x6a   :  { %v85_v13 = vrot.slane %v38_v7, 4 }
  0x78   :  { %v41_v2 = vpop.permute.xlu1 %40  ;;  %v32_v3 = vpop.permute.xlu0 %31 }
  0x79   :  { %v59_v9 = vrot.slane %v32_v3, 4  ;;  %v71_v29 = vrot.slane %v41_v2, 4 }
  0x80   :  { %v26_v11 = vpop.permute.xlu1 %25  ;;  %v44_v12 = vpop.permute.xlu0 %43 }
  0x81   :  { %v60_v14 = vsel %vm47_vm0, %v59_v9, %v26_v11  ;;  %v83_v15 = vrot.slane %v44_v12, 4  ;;  %v61_v16 = vrot.slane %v26_v11, 4  ;;  %v86_v24 = vsel %vm47_vm0, %v44_v12, %v85_v13 }
  0x82   :  { %v66_v17 = vperm.slane %v60_v14, %v53_v8  ;;  %v94_v32 = vperm.slane %v86_v24, %v53_v8 }
  0x83   :  { %v84_v19 = vsel %vm47_vm0, %v83_v15, %v38_v7  ;;  %v62_v25 = vsel %vm47_vm0, %v32_v3, %v61_v16 }
  0x84   :  { %v95_v23 = vrot.slane %v66_v17, 4  ;;  %v90_v26 = vperm.slane %v84_v19, %v53_v8  ;;  %v70_v34 = vperm.slane %v62_v25, %v53_v8  ;;  %v98_v42 = vsel %vm47_vm0, %v66_v17, %v97_v28 }
  0x85   :  { %v131_v43 = vrot.slane %v94_v32, 4  ;;  %v106_v51 = vperm.slane %v98_v42, %v101_v30 }
  0x86   :  { %v96_v27 = vsel %vm47_vm0, %v95_v23, %v54_v18  ;;  %v119_v38 = vrot.slane %v90_v26, 4  ;;  %v107_v47 = vrot.slane %v70_v34, 4  ;;  %v110_v6 = vsel %vm47_vm0, %v70_v34, %v109_v62 }
  0x87   :  { %v102_v37 = vperm.slane %v96_v27, %v101_v30  ;;  %v149_v3 = vrot.slane %v106_v51, 4  ;;  %v118_v11 = vperm.slane %v110_v6, %v101_v30  ;;  %v192_v23 = vlaneseq }
  0x88   :  { %v35_v33 = vpop.permute.xlu0 %34  ;;  %v108_v0 = vsel %vm47_vm0, %v107_v47, %v58_v40 }
  0x89   :  { %v72_v35 = vsel %vm47_vm0, %v71_v29, %v35_v33  ;;  %v73_v36 = vrot.slane %v35_v33, 4  ;;  %v145_v49 = vrot.slane %v102_v37, 4  ;;  %v157_v18 = vrot.slane %v118_v11, 4 }
  0x8a   :  { %v78_v39 = vperm.slane %v72_v35, %v53_v8  ;;  %v193_v25 = vand.u32 127, %v192_v23 }
  0x8b   :  { %v74_v41 = vsel %vm47_vm0, %v41_v2, %v73_v36 }
  0x8c   :  { %v82_v44 = vperm.slane %v74_v41, %v53_v8  ;;  %v121_v45 = vrot.slane %v78_v39, 4  ;;  %v120_v46 = vsel %vm47_vm0, %v119_v38, %v78_v39  ;;  %v114_v8 = vperm.slane %v108_v0, %v101_v30 }
  0x8d   :  { %v126_v48 = vperm.slane %v120_v46, %v101_v30 }
  0x8e   :  { %v133_v50 = vrot.slane %v82_v44, 4  ;;  %v122_v52 = vsel %vm47_vm0, %v90_v26, %v121_v45  ;;  %v132_v53 = vsel %vm47_vm0, %v131_v43, %v82_v44  ;;  %v153_v15 = vrot.slane %v114_v8, 4 }
  0x8f   :  { %v146_v54 = vsel %vm47_vm0, %v126_v48, %v145_v49  ;;  %v143_v55 = vrot.slane %v126_v48, 4  ;;  %v130_v56 = vperm.slane %v122_v52, %v101_v30  ;;  %v138_v57 = vperm.slane %v132_v53, %v101_v30 }
  0x90   :  { %v163_v58 = vsel %vm159_vm1, %v146_v54, -inf  ;;  %v134_v59 = vsel %vm47_vm0, %v94_v32, %v133_v50 }
  0x91   :  { %164 = vmax.xlane.f32.xlu2 %v163_v58  ;;  %v144_v60 = vsel %vm47_vm0, %v143_v55, %v102_v37  ;;  %v147_v61 = vrot.slane %v130_v56, 4  ;;  %v142_v1 = vperm.slane %v134_v59, %v101_v30  ;;  %v151_v4 = vrot.slane %v138_v57, 4 }
  0x92   :  { %v160_v63 = vsel %vm159_vm1, %v144_v60, -inf  ;;  %v150_v7 = vsel %vm47_vm0, %v130_v56, %v149_v3  ;;  %v154_v17 = vsel %vm47_vm0, %v138_v57, %v153_v15 }
  0x93   :  { %161 = vmax.xlane.f32.xlu1 %v160_v63  ;;  %v148_v2 = vsel %vm47_vm0, %v147_v61, %v106_v51  ;;  %v155_v9 = vrot.slane %v142_v1, 4  ;;  %v152_v10 = vsel %vm47_vm0, %v151_v4, %v114_v8  ;;  %v169_v12 = vsel %vm159_vm1, %v150_v7, -inf }
  0x94   :  { %v166_v5 = vsel %vm159_vm1, %v148_v2, -inf  ;;  %v172_v14 = vsel %vm159_vm1, %v152_v10, -inf  ;;  %v158_v19 = vsel %vm47_vm0, %v142_v1, %v157_v18  ;;  %v175_v20 = vsel %vm159_vm1, %v154_v17, -inf }
  0x95   :  { %167 = vmax.xlane.f32.xlu0 %v166_v5  ;;  %v156_v13 = vsel %vm47_vm0, %v155_v9, %v118_v11  ;;  %v181_v21 = vsel %vm159_vm1, %v158_v19, -inf }
  0x96   :  { %v178_v16 = vsel %vm159_vm1, %v156_v13, -inf }
  0x99   :  { %170 = vmax.xlane.f32.xlu2 %v169_v12 }
  0x9b   :  { %173 = vmax.xlane.f32.xlu1 %v172_v14 }
  0x9d   :  { %179 = vmax.xlane.f32.xlu0 %v178_v16 }
  0xa1   :  { %176 = vmax.xlane.f32.xlu2 %v175_v20 }
  0xa3   :  { %182 = vmax.xlane.f32.xlu1 %v181_v21 }
 0x104   :  { %v165_v22 = vpop.xlane.xlu2 %164 }
 0x105   :  { %v195_v29 = vperm.slane %v165_v22, %v193_v25 }
 0x106   :  { %v162_v24 = vpop.xlane.xlu1 %161 }
 0x107   :  { %v194_v27 = vperm.slane %v162_v24, %v193_v25 }
 0x108   :  { %v168_v26 = vpop.xlane.xlu0 %167 }
 0x109   :  { %v196_v30 = vperm.slane %v168_v26, %v193_v25  ;;  %v203_v32 = vsel %vm202_vm2, %v195_v29, %v194_v27 }
 0x10b   :  { %v205_v34 = vsel %vm204_vm3, %v196_v30, %v203_v32 }
 0x10c   :  { %v171_v28 = vpop.xlane.xlu2 %170 }
 0x10d   :  { %v197_v33 = vperm.slane %v171_v28, %v193_v25 }
 0x10e   :  { %v174_v31 = vpop.xlane.xlu1 %173 }
 0x10f   :  { %v198_v35 = vperm.slane %v174_v31, %v193_v25  ;;  %v207_v36 = vsel %vm206_vm4, %v197_v33, %v205_v34 }
 0x110   :  { %v180_v37 = vpop.xlane.xlu0 %179 }
 0x111   :  { %v209_v40 = vsel %vm208_vm5, %v198_v35, %v207_v36  ;;  %v200_v41 = vperm.slane %v180_v37, %v193_v25 }
 0x114   :  { %v177_v38 = vpop.xlane.xlu2 %176 }
 0x115   :  { %v199_v39 = vperm.slane %v177_v38, %v193_v25 }
 0x116   :  { %v183_v42 = vpop.xlane.xlu1 %182 }
 0x117   :  { %v211_v43 = vsel %vm210_vm6, %v199_v39, %v209_v40  ;;  %v201_v44 = vperm.slane %v183_v42, %v193_v25 }
 0x118   :  { %v213_v45 = vsel %vm212_vm7, %v200_v41, %v211_v43 }
 0x119   :  { %v215_v46 = vsel %vm214_vm8, %v201_v44, %v213_v45 }
 0x11a   :  { %218 = vst.msk [vmem:[#allocation5] sm:$0xff] %vm217_vm9, %v215_v46 }
 0x11b   :  { %229 = dma.vmem_to_hbm [thread:$0]  %s225_s18, 128, %s227_s21, [#allocation4]  }
 0x11c   :  { %297 = dma.done.wait [#allocation4], 128  }
 0x11d   :  { %298 = vsyncadd [#allocation4], 4294967168 }
 0x11e   :  { %234 = vsyncpa [#allocation3], 1 }
 0x11f   :  { %235 = vsyncpa [#allocation4], 1 }

// kernel: tpu_custom_call.1
= control target key start
LH: loop header
LB: loop body
LE: loop exit
PB: predicated region body
PF: predicated region fallthrough
CT: control target
= control target key end

     0   :  { %6 = vsyncpa [#allocation3], 0  ;;  %s127_s0 = inlined_call_operand.hbm [shape: f32[2,1,512], index: 0, kind: input, shape index: {}]   ;;  %s128_s1 = inlined_call_operand.hbm [shape: f32[1,512], index: 1, kind: output, shape index: {}]  }
   0x1   :  { %7 = vsyncpa [#allocation4], 0  ;;  %s12_s8 = sshll.u32 %s127_s0, 4  ;;  %s107_s9 = smov [#allocation2]   ;;  %s13_s8 = int_to_ptr.hbm [resolvable:$true] %s12_s8 }
   0x2   :  { %s14_s10 = sshll.u32 %s107_s9, 4  ;;  %s108_s11 = smov 64   ;;  %s15_s10 = int_to_ptr.vmem [resolvable:$true] %s14_s10 }
   0x3   :  { %s109_s12 = smov 4  }
   0x4   :  { %20 = dma.hbm_to_vmem [thread:$0]  %s13_s8, 128, %s15_s10, [#allocation3], %s108_s11, %s108_s11, %s109_s12  }
   0x5   :  { %103 = dma.done.wait [#allocation3], 128  }
   0x6   :  { %104 = vsyncadd [#allocation3], 4294967168  ;;  %v29_v0 = vlaneseq  ;;  %s110_s13 = smov [#allocation5]   ;;  %s41_s17 = sshll.u32 %s128_s1, 4  ;;  %v25_v1 = vld [vmem:[#allocation2] sm:$0xf]  ;;  %s42_s17 = int_to_ptr.hbm [resolvable:$true] %s41_s17 }
   0x7   :  { %s39_s14 = sshll.u32 %s110_s13, 4  ;;  %v27_v2 = vld [vmem:[#allocation2 + $0x4] sm:$0xf]  ;;  %s40_s14 = int_to_ptr.vmem [resolvable:$true] %s39_s14 }
   0x8   :  { %vm31_vm0 = vcmp.lt.s32.totalorder %v29_v0, 512  ;;  %v28_v3 = vmax.f32 %v25_v1, %v27_v2 }
   0xa   :  { %33 = vst.msk [vmem:[#allocation5] sm:$0xf] %vm31_vm0, %v28_v3 }
   0xb   :  { %44 = dma.vmem_to_hbm [thread:$0]  %s40_s14, 64, %s42_s17, [#allocation4]  }
   0xc   :  { %105 = dma.done.wait [#allocation4], 64  }
   0xd   :  { %106 = vsyncadd [#allocation4], 4294967232 }
   0xe   :  { %49 = vsyncpa [#allocation3], 1 }
   0xf   :  { %50 = vsyncpa [#allocation4], 1 }

</bundles_post_ra>
